<compile_context>
chip_gen: v6e
topology: v6e:2x2x1
jax: 0.10.0
libtpu: 0.0.40
codegen_flags: <defaults>
</compile_context>

<pallas_src>
import functools

import jax
import jax.numpy as jnp
from jax.experimental import pallas as pl
from jax.experimental.pallas import tpu as pltpu


def _gelu_exact(x):
    # PyTorch nn.GELU() default: exact erf-based GELU.
    # (tanh approx would move work to the EUP on v5e but changes numerics -> keep exact.)
    return 0.5 * x * (1.0 + jax.lax.erf(x / jnp.sqrt(2.0).astype(x.dtype)))


def _layernorm(x, gamma, beta, eps=1e-5):
    mu = jnp.mean(x, axis=-1, keepdims=True)
    var = jnp.mean((x - mu) ** 2, axis=-1, keepdims=True)
    return (x - mu) * jax.lax.rsqrt(var + eps) * gamma + beta


def block_kernel(xq_ref, xa_ref,
                 ln1_g_ref, ln1_b_ref,
                 wq_ref, wkv_ref,
                 proj_w_ref, proj_b_ref,
                 ln2_g_ref, ln2_b_ref,
                 fc1_w_ref, fc1_b_ref,
                 fc2_w_ref, fc2_b_ref,
                 o_ref, *, num_heads):
    f32 = jnp.float32
    bf16 = jnp.bfloat16

    x_q = xq_ref[...].astype(f32)          # (tq, C)  query-tile rows (residual base)
    x_all = xa_ref[...].astype(f32)        # (N, C)   full sequence (for K/V)
    tq, C = x_q.shape
    hd = C // num_heads

    g1 = ln1_g_ref[...]                    # (1, C) f32
    b1 = ln1_b_ref[...]

    # ---- attention branch ----
    xn_q = _layernorm(x_q, g1, b1)                               # (tq, C)
    xn_all = _layernorm(x_all, g1, b1)                           # (N, C)

    # bf16 MXU matmuls with f32 accumulation; head scale is folded into wq.
    q_flat = jnp.dot(xn_q.astype(bf16), wq_ref[...],
                     preferred_element_type=f32)                 # (tq, C)
    kv_flat = jnp.dot(xn_all.astype(bf16), wkv_ref[...],
                      preferred_element_type=f32)                # (N, 2C)

    # Split heads once (hd on the lane axis), then everything is batched over heads.
    q_h = jnp.stack([q_flat[:, h * hd:(h + 1) * hd]
                     for h in range(num_heads)], axis=0)         # (H, tq, hd)
    k_h = jnp.stack([kv_flat[:, h * hd:(h + 1) * hd]
                     for h in range(num_heads)], axis=0)         # (H, N, hd)
    v_h = jnp.stack([kv_flat[:, C + h * hd: C + (h + 1) * hd]
                     for h in range(num_heads)], axis=0)         # (H, N, hd)

    s = jnp.einsum('hqd,hkd->hqk', q_h.astype(bf16), k_h.astype(bf16),
                   preferred_element_type=f32)                   # (H, tq, N)
    s = s - jnp.max(s, axis=-1, keepdims=True)
    p = jnp.exp(s)
    attn = p * pl.reciprocal(jnp.sum(p, axis=-1, keepdims=True), approx=True)

    o_h = jnp.einsum('hqk,hkd->hqd', attn.astype(bf16), v_h.astype(bf16),
                     preferred_element_type=f32)                 # (H, tq, hd)
    attn_cat = jnp.concatenate([o_h[h] for h in range(num_heads)],
                               axis=-1)                          # (tq, C)

    attn_out = (jnp.dot(attn_cat.astype(bf16), proj_w_ref[...],
                        preferred_element_type=f32) + proj_b_ref[...])
    x1 = x_q + attn_out                                          # residual 1

    # ---- MLP branch ----
    xn2 = _layernorm(x1, ln2_g_ref[...], ln2_b_ref[...])
    h1 = (jnp.dot(xn2.astype(bf16), fc1_w_ref[...],
                  preferred_element_type=f32) + fc1_b_ref[...])
    h1 = _gelu_exact(h1)
    h2 = (jnp.dot(h1.astype(bf16), fc2_w_ref[...],
                  preferred_element_type=f32) + fc2_b_ref[...])
    x2 = x1 + h2                                                 # residual 2

    o_ref[...] = x2.astype(o_ref.dtype)


def transformer_block(x, params, *, num_heads, q_tile=None):
    B, N, C = x.shape
    Hm = params["fc1_w"].shape[1]
    assert C % num_heads == 0
    hd = C // num_heads
    scale = hd ** -0.5

    # query-tile size (sequence tiling); multiples of 256 preferred for MXU feed.
    if q_tile is None:
        if N % 256 == 0:
            q_tile = 256
        elif N % 128 == 0:
            q_tile = 128
        else:
            q_tile = N
    assert N % q_tile == 0
    nq = N // q_tile

    # bf16 weights (halves weight DMA/VMEM); attention scale folded into Wq.
    bf16 = jnp.bfloat16
    qkv_w = params["qkv_w"]
    wq = (qkv_w[:, :C] * scale).astype(bf16)    # (C, C)
    wkv = qkv_w[:, C:].astype(bf16)             # (C, 2C)  [K | V]
    proj_w = params["proj_w"].astype(bf16)
    fc1_w = params["fc1_w"].astype(bf16)
    fc2_w = params["fc2_w"].astype(bf16)

    def const_spec(shape):
        return pl.BlockSpec(shape, lambda b, i: (0,) * len(shape))

    in_specs = [
        pl.BlockSpec((None, q_tile, C), lambda b, i: (b, i, 0)),   # x: query tile
        pl.BlockSpec((None, N, C), lambda b, i: (b, 0, 0)),        # x: full sequence
        const_spec((1, C)), const_spec((1, C)),                    # ln1 gamma/beta
        const_spec((C, C)),                                        # Wq (scale folded)
        const_spec((C, 2 * C)),                                    # Wkv
        const_spec((C, C)), const_spec((1, C)),                    # proj w/b
        const_spec((1, C)), const_spec((1, C)),                    # ln2 gamma/beta
        const_spec((C, Hm)), const_spec((1, Hm)),                  # fc1 w/b
        const_spec((Hm, C)), const_spec((1, C)),                   # fc2 w/b
    ]
    out_spec = pl.BlockSpec((None, q_tile, C), lambda b, i: (b, i, 0))

    return pl.pallas_call(
        functools.partial(block_kernel, num_heads=num_heads),
        out_shape=jax.ShapeDtypeStruct((B, N, C), x.dtype),
        grid_spec=pltpu.PrefetchScalarGridSpec(
            num_scalar_prefetch=0,
            grid=(B, nq),
            in_specs=in_specs,
            out_specs=out_spec,
        ),
        compiler_params=pltpu.CompilerParams(
            dimension_semantics=("parallel", "parallel"),
            vmem_limit_bytes=64 * 1024 * 1024,
        ),
    )(x, x,
      params["ln1_g"], params["ln1_b"],
      wq, wkv,
      proj_w, params["proj_b"],
      params["ln2_g"], params["ln2_b"],
      fc1_w, params["fc1_b"],
      fc2_w, params["fc2_b"])


def ref_block(x, params, *, num_heads):
    # Pure-JAX f32 reference mirroring the PyTorch module (dropout = 0 -> identity).
    B, N, C = x.shape
    hd = C // num_heads
    scale = hd ** -0.5

    def ln(v, g, b):
        mu = jnp.mean(v, axis=-1, keepdims=True)
        var = jnp.mean((v - mu) ** 2, axis=-1, keepdims=True)
        return (v - mu) * jax.lax.rsqrt(var + 1e-5) * g + b

    xn = ln(x, params["ln1_g"][0], params["ln1_b"][0])
    qkv = xn @ params["qkv_w"]                                           # (B, N, 3C)
    qkv = qkv.reshape(B, N, 3, num_heads, hd).transpose(2, 0, 3, 1, 4)
    q, k, v = qkv[0], qkv[1], qkv[2]                                     # (B, H, N, hd)
    attn = jnp.einsum("bhnd,bhmd->bhnm", q, k) * scale
    attn = jax.nn.softmax(attn, axis=-1)
    out = jnp.einsum("bhnm,bhmd->bhnd", attn, v)
    out = out.transpose(0, 2, 1, 3).reshape(B, N, C)
    out = out @ params["proj_w"] + params["proj_b"][0]
    x1 = x + out
    xn2 = ln(x1, params["ln2_g"][0], params["ln2_b"][0])
    h1 = _gelu_exact(xn2 @ params["fc1_w"] + params["fc1_b"][0])
    return x1 + (h1 @ params["fc2_w"] + params["fc2_b"][0])


def init_params(key, dim, mlp_ratio=4.0):
    H = int(dim * mlp_ratio)
    ks = jax.random.split(key, 4)
    s = 0.02
    return {
        "ln1_g": jnp.ones((1, dim), jnp.float32),
        "ln1_b": jnp.zeros((1, dim), jnp.float32),
        # stored pre-transposed so forward is x @ W (PyTorch Linear is x @ W.T)
        "qkv_w": s * jax.random.normal(ks[0], (dim, 3 * dim), jnp.float32),
        "proj_w": s * jax.random.normal(ks[1], (dim, dim), jnp.float32),
        "proj_b": jnp.zeros((1, dim), jnp.float32),
        "ln2_g": jnp.ones((1, dim), jnp.float32),
        "ln2_b": jnp.zeros((1, dim), jnp.float32),
        "fc1_w": s * jax.random.normal(ks[2], (dim, H), jnp.float32),
        "fc1_b": jnp.zeros((1, H), jnp.float32),
        "fc2_w": s * jax.random.normal(ks[3], (H, dim), jnp.float32),
        "fc2_b": jnp.zeros((1, dim), jnp.float32),
    }


if __name__ == "__main__":
    B, N, dim, num_heads = 2, 8, 32, 4

    key = jax.random.PRNGKey(0)
    kx, kp = jax.random.split(key)
    x = jax.random.normal(kx, (B, N, dim), jnp.float32)
    params = init_params(kp, dim)

    out = transformer_block(x, params, num_heads=num_heads)
    out = jax.block_until_ready(out)

    ref = ref_block(x, params, num_heads=num_heads)
    assert out.shape == (B, N, dim)
    # bf16 matmuls + approx-reciprocal softmax vs f32 reference -> loose tolerance.
    assert jnp.allclose(out, ref, rtol=1e-2, atol=1e-2), "mismatch vs reference"

    print("KERNEL_OK")
</pallas_src>

<mosaic_0001>
module attributes {stable_mosaic.version = 11 : i64} {
  func.func @block_kernel(%arg0: i32, %arg1: i32, %arg2: memref<1x8x32xf32, #tpu.memory_space<vmem>>, %arg3: memref<1x8x32xf32, #tpu.memory_space<vmem>>, %arg4: memref<1x32xf32, #tpu.memory_space<vmem>>, %arg5: memref<1x32xf32, #tpu.memory_space<vmem>>, %arg6: memref<32x32xbf16, #tpu.memory_space<vmem>>, %arg7: memref<32x64xbf16, #tpu.memory_space<vmem>>, %arg8: memref<32x32xbf16, #tpu.memory_space<vmem>>, %arg9: memref<1x32xf32, #tpu.memory_space<vmem>>, %arg10: memref<1x32xf32, #tpu.memory_space<vmem>>, %arg11: memref<1x32xf32, #tpu.memory_space<vmem>>, %arg12: memref<32x128xbf16, #tpu.memory_space<vmem>>, %arg13: memref<1x128xf32, #tpu.memory_space<vmem>>, %arg14: memref<128x32xbf16, #tpu.memory_space<vmem>>, %arg15: memref<1x32xf32, #tpu.memory_space<vmem>>, %arg16: memref<1x8x32xf32, #tpu.memory_space<vmem>>) attributes {dimension_semantics = [#tpu.dimension_semantics<parallel>, #tpu.dimension_semantics<parallel>], iteration_bounds = array<i64: 2, 1>, scalar_prefetch = 0 : i64, scratch_operands = 0 : i64, tpu.core_type = #tpu.core_type<tc>, window_params = [{transform_indices = @transform_0, window_bounds = array<i64: 1, 8, 32>}, {transform_indices = @transform_1, window_bounds = array<i64: 1, 8, 32>}, {pipeline_mode = #tpu.pipeline_mode<synchronous>, transform_indices = @transform_2, window_bounds = array<i64: 1, 32>}, {pipeline_mode = #tpu.pipeline_mode<synchronous>, transform_indices = @transform_3, window_bounds = array<i64: 1, 32>}, {pipeline_mode = #tpu.pipeline_mode<synchronous>, transform_indices = @transform_4, window_bounds = array<i64: 32, 32>}, {pipeline_mode = #tpu.pipeline_mode<synchronous>, transform_indices = @transform_5, window_bounds = array<i64: 32, 64>}, {pipeline_mode = #tpu.pipeline_mode<synchronous>, transform_indices = @transform_6, window_bounds = array<i64: 32, 32>}, {pipeline_mode = #tpu.pipeline_mode<synchronous>, transform_indices = @transform_7, window_bounds = array<i64: 1, 32>}, {pipeline_mode = #tpu.pipeline_mode<synchronous>, transform_indices = @transform_8, window_bounds = array<i64: 1, 32>}, {pipeline_mode = #tpu.pipeline_mode<synchronous>, transform_indices = @transform_9, window_bounds = array<i64: 1, 32>}, {pipeline_mode = #tpu.pipeline_mode<synchronous>, transform_indices = @transform_10, window_bounds = array<i64: 32, 128>}, {pipeline_mode = #tpu.pipeline_mode<synchronous>, transform_indices = @transform_11, window_bounds = array<i64: 1, 128>}, {pipeline_mode = #tpu.pipeline_mode<synchronous>, transform_indices = @transform_12, window_bounds = array<i64: 128, 32>}, {pipeline_mode = #tpu.pipeline_mode<synchronous>, transform_indices = @transform_13, window_bounds = array<i64: 1, 32>}, {transform_indices = @transform_14, window_bounds = array<i64: 1, 8, 32>}]} {
    %c0 = arith.constant 0 : index
    %c0_0 = arith.constant 0 : index
    %c0_1 = arith.constant 0 : index
    %0 = vector.load %arg2[%c0, %c0_0, %c0_1] : memref<1x8x32xf32, #tpu.memory_space<vmem>>, vector<1x8x32xf32>
    %1 = vector.shape_cast %0 : vector<1x8x32xf32> to vector<8x32xf32>
    %c0_2 = arith.constant 0 : index
    %c0_3 = arith.constant 0 : index
    %c0_4 = arith.constant 0 : index
    %2 = vector.load %arg3[%c0_2, %c0_3, %c0_4] : memref<1x8x32xf32, #tpu.memory_space<vmem>>, vector<1x8x32xf32>
    %3 = vector.shape_cast %2 : vector<1x8x32xf32> to vector<8x32xf32>
    %c0_5 = arith.constant 0 : index
    %c0_6 = arith.constant 0 : index
    %4 = vector.load %arg4[%c0_5, %c0_6] : memref<1x32xf32, #tpu.memory_space<vmem>>, vector<1x32xf32>
    %c0_7 = arith.constant 0 : index
    %c0_8 = arith.constant 0 : index
    %5 = vector.load %arg5[%c0_7, %c0_8] : memref<1x32xf32, #tpu.memory_space<vmem>>, vector<1x32xf32>
    %cst = arith.constant dense<0.000000e+00> : vector<8xf32>
    %6 = vector.multi_reduction <add>, %1, %cst [1] : vector<8x32xf32> to vector<8xf32>
    %7 = vector.shape_cast %6 : vector<8xf32> to vector<8x1xf32>
    %cst_9 = arith.constant 3.200000e+01 : f32
    %8 = vector.broadcast %cst_9 : f32 to vector<8x1xf32>
    %9 = arith.divf %7, %8 : vector<8x1xf32>
    %10 = vector.broadcast %9 : vector<8x1xf32> to vector<8x32xf32>
    %11 = arith.subf %1, %10 : vector<8x32xf32>
    %12 = arith.mulf %11, %11 : vector<8x32xf32>
    %cst_10 = arith.constant dense<0.000000e+00> : vector<8xf32>
    %13 = vector.multi_reduction <add>, %12, %cst_10 [1] : vector<8x32xf32> to vector<8xf32>
    %14 = vector.shape_cast %13 : vector<8xf32> to vector<8x1xf32>
    %cst_11 = arith.constant 3.200000e+01 : f32
    %15 = vector.broadcast %cst_11 : f32 to vector<8x1xf32>
    %16 = arith.divf %14, %15 : vector<8x1xf32>
    %17 = vector.broadcast %9 : vector<8x1xf32> to vector<8x32xf32>
    %18 = arith.subf %1, %17 : vector<8x32xf32>
    %cst_12 = arith.constant 9.99999974E-6 : f32
    %19 = vector.broadcast %cst_12 : f32 to vector<8x1xf32>
    %20 = arith.addf %16, %19 : vector<8x1xf32>
    %21 = math.rsqrt %20 : vector<8x1xf32>
    %22 = vector.broadcast %21 : vector<8x1xf32> to vector<8x32xf32>
    %23 = arith.mulf %18, %22 : vector<8x32xf32>
    %24 = vector.broadcast %4 : vector<1x32xf32> to vector<8x32xf32>
    %25 = arith.mulf %23, %24 : vector<8x32xf32>
    %26 = vector.broadcast %5 : vector<1x32xf32> to vector<8x32xf32>
    %27 = arith.addf %25, %26 : vector<8x32xf32>
    %cst_13 = arith.constant dense<0.000000e+00> : vector<8xf32>
    %28 = vector.multi_reduction <add>, %3, %cst_13 [1] : vector<8x32xf32> to vector<8xf32>
    %29 = vector.shape_cast %28 : vector<8xf32> to vector<8x1xf32>
    %cst_14 = arith.constant 3.200000e+01 : f32
    %30 = vector.broadcast %cst_14 : f32 to vector<8x1xf32>
    %31 = arith.divf %29, %30 : vector<8x1xf32>
    %32 = vector.broadcast %31 : vector<8x1xf32> to vector<8x32xf32>
    %33 = arith.subf %3, %32 : vector<8x32xf32>
    %34 = arith.mulf %33, %33 : vector<8x32xf32>
    %cst_15 = arith.constant dense<0.000000e+00> : vector<8xf32>
    %35 = vector.multi_reduction <add>, %34, %cst_15 [1] : vector<8x32xf32> to vector<8xf32>
    %36 = vector.shape_cast %35 : vector<8xf32> to vector<8x1xf32>
    %cst_16 = arith.constant 3.200000e+01 : f32
    %37 = vector.broadcast %cst_16 : f32 to vector<8x1xf32>
    %38 = arith.divf %36, %37 : vector<8x1xf32>
    %39 = vector.broadcast %31 : vector<8x1xf32> to vector<8x32xf32>
    %40 = arith.subf %3, %39 : vector<8x32xf32>
    %cst_17 = arith.constant 9.99999974E-6 : f32
    %41 = vector.broadcast %cst_17 : f32 to vector<8x1xf32>
    %42 = arith.addf %38, %41 : vector<8x1xf32>
    %43 = math.rsqrt %42 : vector<8x1xf32>
    %44 = vector.broadcast %43 : vector<8x1xf32> to vector<8x32xf32>
    %45 = arith.mulf %40, %44 : vector<8x32xf32>
    %46 = vector.broadcast %4 : vector<1x32xf32> to vector<8x32xf32>
    %47 = arith.mulf %45, %46 : vector<8x32xf32>
    %48 = vector.broadcast %5 : vector<1x32xf32> to vector<8x32xf32>
    %49 = arith.addf %47, %48 : vector<8x32xf32>
    %50 = arith.truncf %27 : vector<8x32xf32> to vector<8x32xbf16>
    %c0_18 = arith.constant 0 : index
    %c0_19 = arith.constant 0 : index
    %51 = vector.load %arg6[%c0_18, %c0_19] : memref<32x32xbf16, #tpu.memory_space<vmem>>, vector<32x32xbf16>
    %cst_20 = arith.constant dense<0.000000e+00> : vector<8x32xf32>
    %52 = tpu.matmul %50, %51, %cst_20 {dimension_numbers = #tpu.dot_dimension_numbers<[1], [0], [0], [1], [0, 0, 1, 1], [], []>} : vector<8x32xbf16>, vector<32x32xbf16>, vector<8x32xf32> -> vector<8x32xf32>
    %53 = arith.truncf %49 : vector<8x32xf32> to vector<8x32xbf16>
    %c0_21 = arith.constant 0 : index
    %c0_22 = arith.constant 0 : index
    %54 = vector.load %arg7[%c0_21, %c0_22] : memref<32x64xbf16, #tpu.memory_space<vmem>>, vector<32x64xbf16>
    %cst_23 = arith.constant dense<0.000000e+00> : vector<8x64xf32>
    %55 = tpu.matmul %53, %54, %cst_23 {dimension_numbers = #tpu.dot_dimension_numbers<[1], [0], [0], [1], [0, 0, 1, 1], [], []>} : vector<8x32xbf16>, vector<32x64xbf16>, vector<8x64xf32> -> vector<8x64xf32>
    %56 = vector.extract_strided_slice %52 {offsets = [0, 0], sizes = [8, 8], strides = [1, 1]} : vector<8x32xf32> to vector<8x8xf32>
    %57 = vector.extract_strided_slice %52 {offsets = [0, 8], sizes = [8, 8], strides = [1, 1]} : vector<8x32xf32> to vector<8x8xf32>
    %58 = vector.extract_strided_slice %52 {offsets = [0, 16], sizes = [8, 8], strides = [1, 1]} : vector<8x32xf32> to vector<8x8xf32>
    %59 = vector.extract_strided_slice %52 {offsets = [0, 24], sizes = [8, 8], strides = [1, 1]} : vector<8x32xf32> to vector<8x8xf32>
    %60 = vector.shape_cast %56 : vector<8x8xf32> to vector<1x8x8xf32>
    %61 = vector.shape_cast %57 : vector<8x8xf32> to vector<1x8x8xf32>
    %62 = vector.shape_cast %58 : vector<8x8xf32> to vector<1x8x8xf32>
    %63 = vector.shape_cast %59 : vector<8x8xf32> to vector<1x8x8xf32>
    %64 = tpu.concatenate %60, %61, %62, %63 in 0 : vector<1x8x8xf32>, vector<1x8x8xf32>, vector<1x8x8xf32>, vector<1x8x8xf32> -> vector<4x8x8xf32>
    %65 = vector.extract_strided_slice %55 {offsets = [0, 0], sizes = [8, 8], strides = [1, 1]} : vector<8x64xf32> to vector<8x8xf32>
    %66 = vector.extract_strided_slice %55 {offsets = [0, 8], sizes = [8, 8], strides = [1, 1]} : vector<8x64xf32> to vector<8x8xf32>
    %67 = vector.extract_strided_slice %55 {offsets = [0, 16], sizes = [8, 8], strides = [1, 1]} : vector<8x64xf32> to vector<8x8xf32>
    %68 = vector.extract_strided_slice %55 {offsets = [0, 24], sizes = [8, 8], strides = [1, 1]} : vector<8x64xf32> to vector<8x8xf32>
    %69 = vector.shape_cast %65 : vector<8x8xf32> to vector<1x8x8xf32>
    %70 = vector.shape_cast %66 : vector<8x8xf32> to vector<1x8x8xf32>
    %71 = vector.shape_cast %67 : vector<8x8xf32> to vector<1x8x8xf32>
    %72 = vector.shape_cast %68 : vector<8x8xf32> to vector<1x8x8xf32>
    %73 = tpu.concatenate %69, %70, %71, %72 in 0 : vector<1x8x8xf32>, vector<1x8x8xf32>, vector<1x8x8xf32>, vector<1x8x8xf32> -> vector<4x8x8xf32>
    %74 = vector.extract_strided_slice %55 {offsets = [0, 32], sizes = [8, 8], strides = [1, 1]} : vector<8x64xf32> to vector<8x8xf32>
    %75 = vector.extract_strided_slice %55 {offsets = [0, 40], sizes = [8, 8], strides = [1, 1]} : vector<8x64xf32> to vector<8x8xf32>
    %76 = vector.extract_strided_slice %55 {offsets = [0, 48], sizes = [8, 8], strides = [1, 1]} : vector<8x64xf32> to vector<8x8xf32>
    %77 = vector.extract_strided_slice %55 {offsets = [0, 56], sizes = [8, 8], strides = [1, 1]} : vector<8x64xf32> to vector<8x8xf32>
    %78 = vector.shape_cast %74 : vector<8x8xf32> to vector<1x8x8xf32>
    %79 = vector.shape_cast %75 : vector<8x8xf32> to vector<1x8x8xf32>
    %80 = vector.shape_cast %76 : vector<8x8xf32> to vector<1x8x8xf32>
    %81 = vector.shape_cast %77 : vector<8x8xf32> to vector<1x8x8xf32>
    %82 = tpu.concatenate %78, %79, %80, %81 in 0 : vector<1x8x8xf32>, vector<1x8x8xf32>, vector<1x8x8xf32>, vector<1x8x8xf32> -> vector<4x8x8xf32>
    %83 = arith.truncf %64 : vector<4x8x8xf32> to vector<4x8x8xbf16>
    %84 = arith.truncf %73 : vector<4x8x8xf32> to vector<4x8x8xbf16>
    "tpu.trace_start"() <{level = 10 : i32, message = "hqd,hkd->hqk"}> : () -> ()
    %cst_24 = arith.constant dense<0.000000e+00> : vector<4x8x8xf32>
    %85 = tpu.matmul %83, %84, %cst_24 {dimension_numbers = #tpu.dot_dimension_numbers<[2], [2], [1], [1], [0, 0, 0, 1, 1, 1], [0], [0]>} : vector<4x8x8xbf16>, vector<4x8x8xbf16>, vector<4x8x8xf32> -> vector<4x8x8xf32>
    "tpu.trace_stop"() : () -> ()
    %cst_25 = arith.constant dense<0xFF800000> : vector<4x8xf32>
    %86 = vector.multi_reduction <maximumf>, %85, %cst_25 [2] : vector<4x8x8xf32> to vector<4x8xf32>
    %87 = vector.shape_cast %86 : vector<4x8xf32> to vector<4x8x1xf32>
    %88 = vector.broadcast %87 : vector<4x8x1xf32> to vector<4x8x8xf32>
    %89 = arith.subf %85, %88 : vector<4x8x8xf32>
    %90 = math.exp %89 : vector<4x8x8xf32>
    %cst_26 = arith.constant dense<0.000000e+00> : vector<4x8xf32>
    %91 = vector.multi_reduction <add>, %90, %cst_26 [2] : vector<4x8x8xf32> to vector<4x8xf32>
    %92 = vector.shape_cast %91 : vector<4x8xf32> to vector<4x8x1xf32>
    %93 = tpu.reciprocal %92 {approx = true} : vector<4x8x1xf32> -> vector<4x8x1xf32>
    %94 = vector.broadcast %93 : vector<4x8x1xf32> to vector<4x8x8xf32>
    %95 = arith.mulf %90, %94 : vector<4x8x8xf32>
    %96 = arith.truncf %95 : vector<4x8x8xf32> to vector<4x8x8xbf16>
    %97 = arith.truncf %82 : vector<4x8x8xf32> to vector<4x8x8xbf16>
    "tpu.trace_start"() <{level = 10 : i32, message = "hqk,hkd->hqd"}> : () -> ()
    %cst_27 = arith.constant dense<0.000000e+00> : vector<4x8x8xf32>
    %98 = tpu.matmul %96, %97, %cst_27 {dimension_numbers = #tpu.dot_dimension_numbers<[2], [1], [1], [2], [0, 0, 0, 1, 1, 2], [0], [0]>} : vector<4x8x8xbf16>, vector<4x8x8xbf16>, vector<4x8x8xf32> -> vector<4x8x8xf32>
    "tpu.trace_stop"() : () -> ()
    %99 = vector.extract_strided_slice %98 {offsets = [0, 0, 0], sizes = [1, 8, 8], strides = [1, 1, 1]} : vector<4x8x8xf32> to vector<1x8x8xf32>
    %100 = vector.shape_cast %99 : vector<1x8x8xf32> to vector<8x8xf32>
    %101 = vector.extract_strided_slice %98 {offsets = [1, 0, 0], sizes = [1, 8, 8], strides = [1, 1, 1]} : vector<4x8x8xf32> to vector<1x8x8xf32>
    %102 = vector.shape_cast %101 : vector<1x8x8xf32> to vector<8x8xf32>
    %103 = vector.extract_strided_slice %98 {offsets = [2, 0, 0], sizes = [1, 8, 8], strides = [1, 1, 1]} : vector<4x8x8xf32> to vector<1x8x8xf32>
    %104 = vector.shape_cast %103 : vector<1x8x8xf32> to vector<8x8xf32>
    %105 = vector.extract_strided_slice %98 {offsets = [3, 0, 0], sizes = [1, 8, 8], strides = [1, 1, 1]} : vector<4x8x8xf32> to vector<1x8x8xf32>
    %106 = vector.shape_cast %105 : vector<1x8x8xf32> to vector<8x8xf32>
    %107 = tpu.concatenate %100, %102, %104, %106 in 1 : vector<8x8xf32>, vector<8x8xf32>, vector<8x8xf32>, vector<8x8xf32> -> vector<8x32xf32>
    %108 = arith.truncf %107 : vector<8x32xf32> to vector<8x32xbf16>
    %c0_28 = arith.constant 0 : index
    %c0_29 = arith.constant 0 : index
    %109 = vector.load %arg8[%c0_28, %c0_29] : memref<32x32xbf16, #tpu.memory_space<vmem>>, vector<32x32xbf16>
    %cst_30 = arith.constant dense<0.000000e+00> : vector<8x32xf32>
    %110 = tpu.matmul %108, %109, %cst_30 {dimension_numbers = #tpu.dot_dimension_numbers<[1], [0], [0], [1], [0, 0, 1, 1], [], []>} : vector<8x32xbf16>, vector<32x32xbf16>, vector<8x32xf32> -> vector<8x32xf32>
    %c0_31 = arith.constant 0 : index
    %c0_32 = arith.constant 0 : index
    %111 = vector.load %arg9[%c0_31, %c0_32] : memref<1x32xf32, #tpu.memory_space<vmem>>, vector<1x32xf32>
    %112 = vector.broadcast %111 : vector<1x32xf32> to vector<8x32xf32>
    %113 = arith.addf %110, %112 : vector<8x32xf32>
    %114 = arith.addf %1, %113 : vector<8x32xf32>
    %c0_33 = arith.constant 0 : index
    %c0_34 = arith.constant 0 : index
    %115 = vector.load %arg10[%c0_33, %c0_34] : memref<1x32xf32, #tpu.memory_space<vmem>>, vector<1x32xf32>
    %c0_35 = arith.constant 0 : index
    %c0_36 = arith.constant 0 : index
    %116 = vector.load %arg11[%c0_35, %c0_36] : memref<1x32xf32, #tpu.memory_space<vmem>>, vector<1x32xf32>
    %cst_37 = arith.constant dense<0.000000e+00> : vector<8xf32>
    %117 = vector.multi_reduction <add>, %114, %cst_37 [1] : vector<8x32xf32> to vector<8xf32>
    %118 = vector.shape_cast %117 : vector<8xf32> to vector<8x1xf32>
    %cst_38 = arith.constant 3.200000e+01 : f32
    %119 = vector.broadcast %cst_38 : f32 to vector<8x1xf32>
    %120 = arith.divf %118, %119 : vector<8x1xf32>
    %121 = vector.broadcast %120 : vector<8x1xf32> to vector<8x32xf32>
    %122 = arith.subf %114, %121 : vector<8x32xf32>
    %123 = arith.mulf %122, %122 : vector<8x32xf32>
    %cst_39 = arith.constant dense<0.000000e+00> : vector<8xf32>
    %124 = vector.multi_reduction <add>, %123, %cst_39 [1] : vector<8x32xf32> to vector<8xf32>
    %125 = vector.shape_cast %124 : vector<8xf32> to vector<8x1xf32>
    %cst_40 = arith.constant 3.200000e+01 : f32
    %126 = vector.broadcast %cst_40 : f32 to vector<8x1xf32>
    %127 = arith.divf %125, %126 : vector<8x1xf32>
    %128 = vector.broadcast %120 : vector<8x1xf32> to vector<8x32xf32>
    %129 = arith.subf %114, %128 : vector<8x32xf32>
    %cst_41 = arith.constant 9.99999974E-6 : f32
    %130 = vector.broadcast %cst_41 : f32 to vector<8x1xf32>
    %131 = arith.addf %127, %130 : vector<8x1xf32>
    %132 = math.rsqrt %131 : vector<8x1xf32>
    %133 = vector.broadcast %132 : vector<8x1xf32> to vector<8x32xf32>
    %134 = arith.mulf %129, %133 : vector<8x32xf32>
    %135 = vector.broadcast %115 : vector<1x32xf32> to vector<8x32xf32>
    %136 = arith.mulf %134, %135 : vector<8x32xf32>
    %137 = vector.broadcast %116 : vector<1x32xf32> to vector<8x32xf32>
    %138 = arith.addf %136, %137 : vector<8x32xf32>
    %139 = arith.truncf %138 : vector<8x32xf32> to vector<8x32xbf16>
    %c0_42 = arith.constant 0 : index
    %c0_43 = arith.constant 0 : index
    %140 = vector.load %arg12[%c0_42, %c0_43] : memref<32x128xbf16, #tpu.memory_space<vmem>>, vector<32x128xbf16>
    %cst_44 = arith.constant dense<0.000000e+00> : vector<8x128xf32>
    %141 = tpu.matmul %139, %140, %cst_44 {dimension_numbers = #tpu.dot_dimension_numbers<[1], [0], [0], [1], [0, 0, 1, 1], [], []>} : vector<8x32xbf16>, vector<32x128xbf16>, vector<8x128xf32> -> vector<8x128xf32>
    %c0_45 = arith.constant 0 : index
    %c0_46 = arith.constant 0 : index
    %142 = vector.load %arg13[%c0_45, %c0_46] : memref<1x128xf32, #tpu.memory_space<vmem>>, vector<1x128xf32>
    %143 = vector.broadcast %142 : vector<1x128xf32> to vector<8x128xf32>
    %144 = arith.addf %141, %143 : vector<8x128xf32>
    %cst_47 = arith.constant 5.000000e-01 : f32
    %145 = vector.broadcast %cst_47 : f32 to vector<8x128xf32>
    %146 = arith.mulf %145, %144 : vector<8x128xf32>
    %cst_48 = arith.constant 2.000000e+00 : f32
    %147 = math.sqrt %cst_48 : f32
    %148 = vector.broadcast %147 : f32 to vector<8x128xf32>
    %149 = arith.divf %144, %148 : vector<8x128xf32>
    %150 = math.erf %149 : vector<8x128xf32>
    %cst_49 = arith.constant 1.000000e+00 : f32
    %151 = vector.broadcast %cst_49 : f32 to vector<8x128xf32>
    %152 = arith.addf %151, %150 : vector<8x128xf32>
    %153 = arith.mulf %146, %152 : vector<8x128xf32>
    %154 = arith.truncf %153 : vector<8x128xf32> to vector<8x128xbf16>
    %c0_50 = arith.constant 0 : index
    %c0_51 = arith.constant 0 : index
    %155 = vector.load %arg14[%c0_50, %c0_51] : memref<128x32xbf16, #tpu.memory_space<vmem>>, vector<128x32xbf16>
    %cst_52 = arith.constant dense<0.000000e+00> : vector<8x32xf32>
    %156 = tpu.matmul %154, %155, %cst_52 {dimension_numbers = #tpu.dot_dimension_numbers<[1], [0], [0], [1], [0, 0, 1, 1], [], []>} : vector<8x128xbf16>, vector<128x32xbf16>, vector<8x32xf32> -> vector<8x32xf32>
    %c0_53 = arith.constant 0 : index
    %c0_54 = arith.constant 0 : index
    %157 = vector.load %arg15[%c0_53, %c0_54] : memref<1x32xf32, #tpu.memory_space<vmem>>, vector<1x32xf32>
    %158 = vector.broadcast %157 : vector<1x32xf32> to vector<8x32xf32>
    %159 = arith.addf %156, %158 : vector<8x32xf32>
    %160 = arith.addf %114, %159 : vector<8x32xf32>
    %c0_55 = arith.constant 0 : index
    %c0_56 = arith.constant 0 : index
    %c0_57 = arith.constant 0 : index
    %161 = vector.load %arg16[%c0_55, %c0_56, %c0_57] : memref<1x8x32xf32, #tpu.memory_space<vmem>>, vector<1x8x32xf32>
    %162 = vector.shape_cast %161 : vector<1x8x32xf32> to vector<8x32xf32>
    %163 = vector.shape_cast %160 : vector<8x32xf32> to vector<1x8x32xf32>
    tpu.vector_store %arg16[%c0_55, %c0_56, %c0_57], %163 {strides = array<i32>} : memref<1x8x32xf32, #tpu.memory_space<vmem>>, vector<1x8x32xf32>,
    return
  }
  func.func @transform_0(%arg0: i32, %arg1: i32) -> (i32, i32, i32) {
    %c0_i32 = arith.constant 0 : i32
    %c0_i32_0 = arith.constant 0 : i32
    return %arg0, %arg1, %c0_i32 : i32, i32, i32
  }
  func.func @transform_1(%arg0: i32, %arg1: i32) -> (i32, i32, i32) {
    %c0_i32 = arith.constant 0 : i32
    %c0_i32_0 = arith.constant 0 : i32
    %c0_i32_1 = arith.constant 0 : i32
    return %arg0, %c0_i32, %c0_i32_0 : i32, i32, i32
  }
  func.func @transform_2(%arg0: i32, %arg1: i32) -> (i32, i32) {
    %c0_i32 = arith.constant 0 : i32
    %c0_i32_0 = arith.constant 0 : i32
    %c0_i32_1 = arith.constant 0 : i32
    return %c0_i32, %c0_i32_0 : i32, i32
  }
  func.func @transform_3(%arg0: i32, %arg1: i32) -> (i32, i32) {
    %c0_i32 = arith.constant 0 : i32
    %c0_i32_0 = arith.constant 0 : i32
    %c0_i32_1 = arith.constant 0 : i32
    return %c0_i32, %c0_i32_0 : i32, i32
  }
  func.func @transform_4(%arg0: i32, %arg1: i32) -> (i32, i32) {
    %c0_i32 = arith.constant 0 : i32
    %c0_i32_0 = arith.constant 0 : i32
    %c0_i32_1 = arith.constant 0 : i32
    return %c0_i32, %c0_i32_0 : i32, i32
  }
  func.func @transform_5(%arg0: i32, %arg1: i32) -> (i32, i32) {
    %c0_i32 = arith.constant 0 : i32
    %c0_i32_0 = arith.constant 0 : i32
    %c0_i32_1 = arith.constant 0 : i32
    return %c0_i32, %c0_i32_0 : i32, i32
  }
  func.func @transform_6(%arg0: i32, %arg1: i32) -> (i32, i32) {
    %c0_i32 = arith.constant 0 : i32
    %c0_i32_0 = arith.constant 0 : i32
    %c0_i32_1 = arith.constant 0 : i32
    return %c0_i32, %c0_i32_0 : i32, i32
  }
  func.func @transform_7(%arg0: i32, %arg1: i32) -> (i32, i32) {
    %c0_i32 = arith.constant 0 : i32
    %c0_i32_0 = arith.constant 0 : i32
    %c0_i32_1 = arith.constant 0 : i32
    return %c0_i32, %c0_i32_0 : i32, i32
  }
  func.func @transform_8(%arg0: i32, %arg1: i32) -> (i32, i32) {
    %c0_i32 = arith.constant 0 : i32
    %c0_i32_0 = arith.constant 0 : i32
    %c0_i32_1 = arith.constant 0 : i32
    return %c0_i32, %c0_i32_0 : i32, i32
  }
  func.func @transform_9(%arg0: i32, %arg1: i32) -> (i32, i32) {
    %c0_i32 = arith.constant 0 : i32
    %c0_i32_0 = arith.constant 0 : i32
    %c0_i32_1 = arith.constant 0 : i32
    return %c0_i32, %c0_i32_0 : i32, i32
  }
  func.func @transform_10(%arg0: i32, %arg1: i32) -> (i32, i32) {
    %c0_i32 = arith.constant 0 : i32
    %c0_i32_0 = arith.constant 0 : i32
    %c0_i32_1 = arith.constant 0 : i32
    return %c0_i32, %c0_i32_0 : i32, i32
  }
  func.func @transform_11(%arg0: i32, %arg1: i32) -> (i32, i32) {
    %c0_i32 = arith.constant 0 : i32
    %c0_i32_0 = arith.constant 0 : i32
    %c0_i32_1 = arith.constant 0 : i32
    return %c0_i32, %c0_i32_0 : i32, i32
  }
  func.func @transform_12(%arg0: i32, %arg1: i32) -> (i32, i32) {
    %c0_i32 = arith.constant 0 : i32
    %c0_i32_0 = arith.constant 0 : i32
    %c0_i32_1 = arith.constant 0 : i32
    return %c0_i32, %c0_i32_0 : i32, i32
  }
  func.func @transform_13(%arg0: i32, %arg1: i32) -> (i32, i32) {
    %c0_i32 = arith.constant 0 : i32
    %c0_i32_0 = arith.constant 0 : i32
    %c0_i32_1 = arith.constant 0 : i32
    return %c0_i32, %c0_i32_0 : i32, i32
  }
  func.func @transform_14(%arg0: i32, %arg1: i32) -> (i32, i32, i32) {
    %c0_i32 = arith.constant 0 : i32
    %c0_i32_0 = arith.constant 0 : i32
    return %arg0, %arg1, %c0_i32 : i32, i32, i32
  }
}

</mosaic_0001>

<bundles_post_ra>
// kernel: tpu_custom_call.1
= control target key start
LH: loop header
LB: loop body
LE: loop exit
PB: predicated region body
PF: predicated region fallthrough
CT: control target
= control target key end

     0   :  { %19 = vsyncpa [#allocation3], 0  ;;  %s2453_s0 = inlined_call_operand.vmem [shape: f32[2,8,32], index: 0, kind: input, shape index: {}]   ;;  %s2454_s1 = inlined_call_operand.vmem [shape: f32[2,8,32], index: 1, kind: input, shape index: {}]   ;;  %s2455_s2 = inlined_call_operand.vmem [shape: f32[1,32], index: 2, kind: input, shape index: {}]   ;;  %s2456_s3 = inlined_call_operand.vmem [shape: f32[1,32], index: 3, kind: input, shape index: {}]   ;;  %s2457_s4 = inlined_call_operand.vmem [shape: bf16[32,32], index: 4, kind: input, shape index: {}]   ;;  %s2458_s5 = inlined_call_operand.vmem [shape: bf16[32,64], index: 5, kind: input, shape index: {}]   ;;  %s2459_s6 = inlined_call_operand.vmem [shape: bf16[32,32], index: 6, kind: input, shape index: {}]   ;;  %s2460_s7 = inlined_call_operand.vmem [shape: f32[1,32], index: 7, kind: input, shape index: {}]   ;;  %s2461_s8 = inlined_call_operand.vmem [shape: f32[1,32], index: 8, kind: input, shape index: {}]   ;;  %s2462_s9 = inlined_call_operand.vmem [shape: f32[1,32], index: 9, kind: input, shape index: {}]   ;;  %s2463_s10 = inlined_call_operand.hbm [shape: bf16[32,128], index: 10, kind: input, shape index: {}]   ;;  %s2464_s11 = inlined_call_operand.hbm [shape: f32[1,128], index: 11, kind: input, shape index: {}]   ;;  %s2465_s12 = inlined_call_operand.vmem [shape: bf16[128,32], index: 12, kind: input, shape index: {}]   ;;  %s2466_s13 = inlined_call_operand.vmem [shape: f32[1,32], index: 13, kind: input, shape index: {}]   ;;  %s2467_s14 = inlined_call_operand.hbm [shape: f32[2,8,32], index: 14, kind: output, shape index: {}]  }
   0x1   :  { %20 = vsyncpa [#allocation6], 0 }
   0x2   :  { %21 = vsyncpa [#allocation4], 0 }
   0x3   :  { %23 = vsyncpa [#allocation4 + $0x1], 0  ;;  %s2123_s29 = smov 0   ;;  %s2125_s30 = smov 0  }
   0x4   :  { %s2127_s15 = smov 0   ;;  %s2129_s16 = smov 0  }
   0x5   :  { %s2131_s17 = smov 0   ;;  %s2133_s18 = smov 0  }
   0x6 LB: > { %2475 = sst [smem:[#allocation11_spill]] %s2012_s29  ;;  %s1581_s19 = sadd.s32 4294967295, %s2032_s18   ;;  %s2032_s18 = sphi %s2133_s18, %s29_s18   ;;  %s2028_s17 = sphi %s2131_s17, %s2494_s17   ;;  %s2024_s16 = sphi %s2129_s16, %s2493_s16   ;;  %s2020_s15 = sphi %s2127_s15, %s2492_s15   ;;  %s2016_s30 = sphi %s2125_s30, %s2496_s30   ;;  %s2012_s29 = sphi %s2123_s29, %s2495_s29  }
   0x7   : > { %2476 = sst [smem:[#allocation12_spill]] %s2020_s15  ;;  %s1582_s20 = sadd.s32 4294967294, %s2032_s18  }
   0x8   : > { %2477 = sst [smem:[#allocation13_spill]] %s2028_s17  ;;  %s41_s21 = sadd.s32 1, %s2028_s17 }
   0x9   : > { %2478 = sst [smem:[#allocation14_spill]] %s2032_s18  ;;  %s356_s22 = sadd.s32 1, %s2020_s15 }
   0xa   : > { %p43_p0 = scmp.ge.s32.totalorder %s41_s21, 2  ;;  %p366_p1 = scmp.ne.s32.totalorder %s2020_s15, %s2016_s30 }
   0xb   : > { %p367_p2 = scmp.eq.s32.totalorder %s1581_s19, 1  ;;  %p372_p3 = scmp.ne.s32.totalorder %s2016_s30, %s2012_s29 }
   0xc   : > { %s2498_s21 = smov (%p43_p0, %s41_s21), 0  ;;  %p373_p5 = scmp.eq.s32.totalorder %s1582_s20, 1 }
   0xd   : > { %2479 = sst [smem:[#allocation15_spill]] %s2498_s21  ;;  %p2163_p4 = por %p367_p2, %p366_p1 }
   0xe   : > { %s351_s24 = ssub.s32 %s2028_s17, %s2498_s21  ;;  %p1583_p6 = scmp.ge.s32.totalorder %s2032_s18, 1 }
   0xf   : > { %p354_p7 = scmp.eq.s32.totalorder %s351_s24, 0  ;;  %p2170_p8 = por %p373_p5, %p372_p3 }
  0x10   : > { %p380_p9 = scmp.lt.s32.totalorder %s2032_s18, 3  ;;  %p2182_p11 = scmp.eq.s32.totalorder %s1581_s19, 0 }
  0x11   : > { %s2481_s25 = scalar_select %p2170_p8, 1, 0 }
  0x12   : > { %s2176_s26 = scalar_select %p354_p7, %s2020_s15, %s356_s22  }
  0x13   : > { %2482 = sst [smem:[#allocation16_spill]] %s2481_s25  ;;  %p2178_p10 = pnand %p1583_p6, %p380_p9 }
  0x14   : > { %2483 = sst [smem:[#allocation17_spill]] %s2176_s26  ;;  %s2034_s20 = smov [#allocation2]  }
  0x15   : > { %p1779_p12 = pneg %p2178_p10  ;;  %s416_s24 = sshll.u32 %s2034_s20, 4  ;;  %s417_s24 = int_to_ptr.vmem [resolvable:$true] %s416_s24 }
  0x16   : > { %s2035_s22 = smov [#allocation5]   ;;  %s1907_s19 = scalar_lea.vmem %s417_s24, 256 }
  0x17   : > { %p2190_p13 = pnand %p2182_p11, %p1779_p12  ;;  %s430_s17 = sshll.u32 %s2035_s22, 4  ;;  %s431_s17 = int_to_ptr.vmem [resolvable:$true] %s430_s17 }
  0x18   : > { %p1908_p1 = scmp.ne.s32.totalorder %s417_s24, %s1907_s19  ;;  %p1915_p5 = scmp.lt.s32.totalorder %s417_s24, %s417_s24 }
  0x19   : > { %p1898_p0 = pneg %p2190_p13  ;;  %p1916_p6 = scmp.lt.s32.totalorder %s1907_s19, %s1907_s19 }
  0x1b   : > { %p1910_p2 = pnand %p1908_p1, %p1898_p0  ;;  %p1917_p7 = por %p1916_p6, %p1915_p5 }
  0x1d   : > { %p1911_p3 = pneg %p1910_p2 }
  0x1f   : > { %p1918_p9 = pnand %p1917_p7, %p1911_p3 }
  0x21   : > { %1921 = shalt.err (!%p1918_p9)
}
  0x22   : > { %s2036_s20 = smov 64   ;;  %s2037_s26 = smov 4  }
  0x23   : > { %1782 = dma.hbm_to_vmem [thread:$0]  (!%p2190_p13), %s2463_s10, 256, %s417_s24, [#allocation3], %s2036_s20, %s2036_s20, %s2037_s26  }
  0x24   : > { %s1933_s25 = scalar_lea.vmem %s431_s17, 16  ;;  %s1940_s29 = scalar_lea.vmem %s431_s17, 32 }
  0x25   : > { %p1934_p12 = scmp.ne.s32.totalorder %s431_s17, %s1933_s25  ;;  %p1941_p8 = scmp.lt.s32.totalorder %s431_s17, %s431_s17 }
  0x26   : > { %p1942_p5 = scmp.lt.s32.totalorder %s1940_s29, %s1933_s25 }
  0x27   : > { %p1936_p1 = pnand %p1934_p12, %p1898_p0 }
  0x28   : > { %p1943_p3 = por %p1942_p5, %p1941_p8 }
  0x29   : > { %p1937_p2 = pneg %p1936_p1 }
  0x2b   : > { %p1944_p6 = pnand %p1943_p3, %p1937_p2 }
  0x2d   : > { %1947 = shalt.err (!%p1944_p6)
}
  0x2e   : > { %1785 = dma.hbm_to_vmem [thread:$0]  (!%p2190_p13), %s2464_s11, 16, %s431_s17, [#allocation6]  }
  0x2f   : > { %466 = sbr.rel (%p2178_p10) target bundleno = 2509 (0x9cd), region = 76 }
  0x34   : > { %1999 = dma.done.wait (%p2182_p11), [#allocation3], 256  }
  0x35   : > { %2001 = vsyncadd (%p2182_p11), [#allocation3], 4294967040 }
  0x36   : > { %2003 = dma.done.wait (%p2182_p11), [#allocation6], 16  }
  0x37   : > { %2005 = vsyncadd (%p2182_p11), [#allocation6], 4294967280  ;;  %p522_p8 = scmp.lt.s32.totalorder %s2024_s16, 1  ;;  %vm538_vm0 = vcmask 261120   ;;  %v1856_v14 = vld [vmem:[%s2457_s4 + $0x8] sm:$0xff]   ;;  %v2038_v15 = vmov 0.0  }
  0x38   : > { %1669 = vmatprep.subr.bf16.mxu1 %v2038_v15  ;;  %vm2039_vm1 = vmmov 0   ;;  %v1857_v16 = vld [vmem:[%s2457_s4] sm:$0xff]   ;;  %1697 = vmatprep.subr.bf16.mxu0 %v2038_v15  ;;  %v1858_v31 = vld [vmem:[%s2458_s5 + $0x8] sm:$0xff]   ;;  %vm730_vm2 = vcmask 64512   ;;  %s2041_s28 = smov 112   ;;  %s2042_s24 = smov 104  }
  0x39   : > { %s523_s29 = scalar_select %p522_p8, %s2024_s16, 1  ;;  %1673 = vmatprep.mubr.msk.bf16.mxu1 %vm2039_vm1, %v2038_v15  ;;  %1670 = vmatpush3.bf16.msra.mxu1 %v1856_v14  ;;  %v1593_v24 = vld [vmem:[%s2455_s2] ss:$0 sm:$0xff]  ;;  %vm969_vm3 = vcmask 1043456   ;;  %vm1173_vm4 = vcmask 130048   ;;  %vm1175_vm5 = vcmask 195584  }
  0x3a   : > { %1671 = vmatprep.subr.bf16.mxu1 %v2038_v15  ;;  %1699 = vmatprep.mubr.msk.bf16.mxu0 %vm2039_vm1, %v2038_v15  ;;  %v1594_v26 = vld [vmem:[%s2456_s3] ss:$0 sm:$0xff]  ;;  %s2043_s20 = smov 96   ;;  %s1629_s25 = sshll.u32 %s2024_s16, 7 }
  0x3b   : > { %s1591_s15 = sshll.u32 %s523_s29, 3  ;;  %v1859_v34 = vld [vmem:[%s2458_s5] sm:$0xff]   ;;  %s2044_s29 = smov 16  }
  0x3c   : > { %s528_s21 = scalar_lea.vmem %s2453_s0, %s1591_s15  ;;  %s532_s27 = scalar_lea.vmem %s2454_s1, %s1591_s15 }
  0x3d   : > { %v2230_v0 = vld [vmem:[%s528_s21] sm:$0xff]  ;;  %1672 = vmatpush3.bf16.msra.mxu1 %v1857_v16  ;;  %s2045_s15 = smov 8   ;;  %s2046_s21 = smov 24  }
  0x3e   : > { %v535_v1 = vld [vmem:[%s532_s27] sm:$0xff]  ;;  %v539_v2 = vsel %vm538_vm0, %v2230_v0, 0.0  ;;  %1677 = vmatprep.subr.bf16.mxu1 %v2038_v15  ;;  %s2040_s27 = smov 120   ;;  %s2047_s19 = smov [#allocation7]  }
  0x3f   : > { %v567_v3 = vsel %vm538_vm0, %v535_v1, 0.0  ;;  %540 = vadd.xlane.f32.xlu0 %v539_v2 }
  0x43   : > { %568 = vadd.xlane.f32.xlu0 %v567_v3 }
  0xc8   : > { %v541_v4 = vpop.xlane.xlu0 %540 }
  0xc9   : > { %v543_v5 = vmul.f32 0.03125, %v541_v4 }
  0xcb   : > { %v544_v6 = vsub.f32 %v2230_v0, %v543_v5 }
  0xcc   : > { %v569_v7 = vpop.xlane.xlu0 %568 }
  0xcd   : > { %v570_v8 = vmul.f32 0.03125, %v569_v7  ;;  %v545_v9 = vmul.f32 %v544_v6, %v544_v6 }
  0xcf   : > { %v571_v10 = vsub.f32 %v535_v1, %v570_v8  ;;  %v546_v11 = vsel %vm538_vm0, %v545_v9, 0.0 }
  0xd0   : > { %547 = vadd.xlane.f32.xlu1 %v546_v11 }
  0xd1   : > { %v572_v12 = vmul.f32 %v571_v10, %v571_v10 }
  0xd3   : > { %v573_v13 = vsel %vm538_vm0, %v572_v12, 0.0 }
  0xd4   : > { %574 = vadd.xlane.f32.xlu1 %v573_v13 }
 0x159   : > { %v548_v17 = vpop.xlane.xlu1 %547 }
 0x15a   : > { %v549_v18 = vmul.f32 0.03125, %v548_v17 }
 0x15c   : > { %v550_v19 = vadd.f32 1e-05, %v549_v18 }
 0x15d   : > { %v575_v20 = vpop.xlane.xlu1 %574 }
 0x15e   : > { %1872 = vrsqrt.f32 %v550_v19  ;;  %v576_v21 = vmul.f32 0.03125, %v575_v20 }
 0x160   : > { %v577_v22 = vadd.f32 1e-05, %v576_v21 }
 0x162   : > { %1874 = vrsqrt.f32 %v577_v22 }
 0x16b   : > { %v1873_v23 = vpop.eup %1872 }
 0x16c   : > { %v552_v25 = vmul.f32 %v1873_v23, %v544_v6 }
 0x16e   : > { %v559_v27 = vmul.f32 %v1593_v24, %v552_v25 }
 0x16f   : > { %v1875_v28 = vpop.eup %1874 }
 0x170   : > { %v566_v29 = vadd.f32 %v1594_v26, %v559_v27  ;;  %v579_v30 = vmul.f32 %v1875_v28, %v571_v10 }
 0x172   : > { %v580_v32 = vmul.f32 %v1593_v24, %v579_v30  ;;  %v582_v33 = vpack.c.bf16 %v566_v29, %v566_v29 }
 0x174   : > { %1674 = vmatmul.mubr.msk.bf16.vlgmr.msra.gmra.mxu1 %vm538_vm0, %v582_v33  ;;  %v581_v35 = vadd.f32 %v1594_v26, %v580_v32 }
 0x175   : > { %1678 = vmatpush3.bf16.msra.mxu1 %v1858_v31  ;;  %1681 = vmatprep.mubr.msk.bf16.mxu1 %vm2039_vm1, %v2038_v15 }
 0x176   : > { %1679 = vmatprep.subr.bf16.mxu1 %v2038_v15  ;;  %v642_v36 = vpack.c.bf16 %v581_v35, %v581_v35 }
 0x179   : > { %1680 = vmatpush3.bf16.msra.mxu1 %v1859_v34 }
 0x17a   : > { %1685 = vmatprep.subr.bf16.mxu1 %v2038_v15 }
 0x17c   : > { %1682 = vmatmul.mubr.msk.bf16.vlgmr.msra.gmra.mxu1 %vm538_vm0, %v642_v36 }
 0x17d   : > { %1687 = vmatprep.mubr.msk.bf16.mxu1 %vm2039_vm1, %v2038_v15 }
 0x234   : > { %v636_v37 = vpop.f32.mrf.mxu1 }
 0x235   : > { %703 = vrot.lane.b32.xlu1 %v636_v37, %s2040_s27  ;;  %v722_v47 = vpack.c.bf16 %v636_v37, %v636_v37 }
 0x236   : > { %v1675_v38 = vpop.f32.mrf.mxu1 }
 0x238   : > { %v639_v39 = vpop.f32.mrf.mxu1 }
 0x23a   : > { %v1676_v40 = vpop.f32.mrf.mxu1 }
 0x23c   : > { %v696_v41 = vpop.f32.mrf.mxu1 }
 0x23d   : > { %716 = vrot.lane.b32.xlu1 %v696_v41, %s2041_s28  ;;  %713 = vrot.lane.b32.xlu0 %v696_v41, %s2040_s27  ;;  %v2272_v42 = vpack.c.bf16 %v696_v41, %v696_v41 }
 0x23e   : > { %v1683_v43 = vpop.f32.mrf.mxu1 }
 0x23f   : > { %v735_v44 = vsel %vm730_vm2, %v2272_v42, 0 }
 0x240   : > { %v699_v45 = vpop.f32.mrf.mxu1  ;;  %1686 = vmatpush3.bf16.xpose.msra.mxu1 %v735_v44 }
 0x241   : > { %719 = vrot.lane.b32.xlu1 %v696_v41, %s2042_s24  ;;  %706 = vrot.lane.b32.xlu0 %v636_v37, %s2041_s28 }
 0x242   : > { %v1684_v46 = vpop.f32.mrf.mxu1  ;;  %1691 = vmatprep.subr.bf16.mxu1 %v2038_v15 }
 0x245   : > { %709 = vrot.lane.b32.xlu1 %v636_v37, %s2042_s24 }
 0x247   : > { %1688 = vmatmul.mubr.msk.bf16.vlgmr.msra.gmra.mxu1 %vm730_vm2, %v722_v47 }
 0x248   : > { %1693 = vmatprep.mubr.msk.bf16.mxu1 %vm2039_vm1, %v2038_v15 }
 0x2a7   : > { %v704_v48 = vpop.permute.xlu1 %703 }
 0x2a8   : > { %v723_v58 = vpack.c.bf16 %v704_v48, %v704_v48 }
 0x2af   : > { %v714_v49 = vpop.permute.xlu0 %713  ;;  %v717_v50 = vpop.permute.xlu1 %716 }
 0x2b0   : > { %v2280_v51 = vpack.c.bf16 %v714_v49, %v714_v49  ;;  %v2282_v52 = vpack.c.bf16 %v717_v50, %v717_v50 }
 0x2b2   : > { %v781_v53 = vsel %vm730_vm2, %v2280_v51, 0  ;;  %v827_v54 = vsel %vm730_vm2, %v2282_v52, 0 }
 0x2b3   : > { %1692 = vmatpush3.bf16.xpose.msra.mxu1 %v781_v53  ;;  %1698 = vmatpush3.bf16.xpose.msra.mxu0 %v827_v54  ;;  %v720_v55 = vpop.permute.xlu1 %719  ;;  %v707_v56 = vpop.permute.xlu0 %706 }
 0x2b4   : > { %1703 = vmatprep.subr.bf16.mxu1 %v2038_v15  ;;  %1709 = vmatprep.subr.bf16.mxu0 %v2038_v15  ;;  %v2290_v57 = vpack.c.bf16 %v720_v55, %v720_v55  ;;  %v724_v59 = vpack.c.bf16 %v707_v56, %v707_v56 }
 0x2b6   : > { %v873_v60 = vsel %vm730_vm2, %v2290_v57, 0 }
 0x2b7   : > { %v710_v61 = vpop.permute.xlu1 %709 }
 0x2b8   : > { %v725_v62 = vpack.c.bf16 %v710_v61, %v710_v61 }
 0x2ba   : > { %1694 = vmatmul.mubr.msk.bf16.vlgmr.msra.gmra.mxu1 %vm730_vm2, %v723_v58  ;;  %1700 = vmatmul.mubr.msk.bf16.vlgmr.msra.gmra.mxu0 %vm730_vm2, %v724_v59 }
 0x2bb   : > { %1704 = vmatpush3.bf16.xpose.msra.mxu1 %v873_v60  ;;  %1705 = vmatprep.mubr.msk.bf16.mxu1 %vm2039_vm1, %v2038_v15 }
 0x2bc   : > { %1715 = vmatprep.subr.bf16.mxu1 %v2038_v15  ;;  %1711 = vmatprep.mubr.msk.bf16.mxu0 %vm2039_vm1, %v2038_v15 }
 0x2c2   : > { %1706 = vmatmul.mubr.msk.bf16.vlgmr.msra.gmra.mxu1 %vm730_vm2, %v725_v62 }
 0x2c3   : > { %1717 = vmatprep.mubr.msk.bf16.mxu1 %vm2039_vm1, %v2038_v15 }
 0x307   : > { %v771_v63 = vpop.f32.mrf.mxu1 }
 0x308   : > { %v915_v1 = vsel %vm730_vm2, %v771_v63, -inf }
 0x309   : > { %916 = vmax.xlane.f32.xlu0 %v915_v1  ;;  %v1689_v2 = vpop.f32.mrf.mxu1 }
 0x30b   : > { %v774_v3 = vpop.f32.mrf.mxu1 }
 0x30c   : > { %v1860_v3 = vld [vmem:[%s2459_s6 + $0x8] sm:$0xff]  }
 0x30d   : > { %v1690_v4 = vpop.f32.mrf.mxu1 }
 0x37a   : > { %v817_v5 = vpop.f32.mrf.mxu1  ;;  %v863_v6 = vpop.f32.mrf.mxu0 }
 0x37b   : > { %v918_v7 = vsel %vm730_vm2, %v817_v5, -inf  ;;  %v921_v8 = vsel %vm730_vm2, %v863_v6, -inf }
 0x37c   : > { %919 = vmax.xlane.f32.xlu1 %v918_v7  ;;  %v1695_v9 = vpop.f32.mrf.mxu1  ;;  %922 = vmax.xlane.f32.xlu0 %v921_v8  ;;  %v1701_v10 = vpop.f32.mrf.mxu0 }
 0x37e   : > { %v820_v11 = vpop.f32.mrf.mxu1  ;;  %v866_v12 = vpop.f32.mrf.mxu0 }
 0x380   : > { %v1696_v13 = vpop.f32.mrf.mxu1  ;;  %v1702_v14 = vpop.f32.mrf.mxu0 }
 0x382   : > { %v909_v16 = vpop.f32.mrf.mxu1 }
 0x383   : > { %v924_v17 = vsel %vm730_vm2, %v909_v16, -inf }
 0x384   : > { %925 = vmax.xlane.f32.xlu0 %v924_v17  ;;  %v1707_v18 = vpop.f32.mrf.mxu1 }
 0x386   : > { %v912_v19 = vpop.f32.mrf.mxu1 }
 0x388   : > { %v1708_v20 = vpop.f32.mrf.mxu1 }
 0x392   : > { %v917_v21 = vpop.xlane.xlu0 %916 }
 0x393   : > { %v927_v22 = vsub.f32 %v771_v63, %v917_v21 }
 0x395   : > { %v931_v23 = vmul.f32 1.442695, %v927_v22 }
 0x397   : > { %1876 = vpow2.f32 %v931_v23 }
 0x3a4   : > { %v1877_v24 = vpop.eup %1876 }
 0x3a5   : > { %v939_v25 = vsel %vm730_vm2, %v1877_v24, 0.0 }
 0x3a6   : > { %940 = vadd.xlane.f32.xlu0 %v939_v25 }
 0x405   : > { %v923_v26 = vpop.xlane.xlu0 %922  ;;  %v920_v27 = vpop.xlane.xlu1 %919 }
 0x406   : > { %v929_v28 = vsub.f32 %v863_v6, %v923_v26  ;;  %v928_v29 = vsub.f32 %v817_v5, %v920_v27 }
 0x408   : > { %v935_v30 = vmul.f32 1.442695, %v929_v28  ;;  %v933_v31 = vmul.f32 1.442695, %v928_v29  ;;  %v1609_v28 = vld [vmem:[%s2460_s7] ss:$0 sm:$0xff] }
 0x40a   : > { %1878 = vpow2.f32 %v935_v30 }
 0x40b   : > { %1880 = vpow2.f32 %v933_v31 }
 0x40d   : > { %v926_v36 = vpop.xlane.xlu0 %925 }
 0x40e   : > { %v930_v37 = vsub.f32 %v909_v16, %v926_v36  ;;  %v1861_v16 = vld [vmem:[%s2459_s6] sm:$0xff]  }
 0x410   : > { %v937_v38 = vmul.f32 1.442695, %v930_v37 }
 0x412   : > { %1882 = vpow2.f32 %v937_v38 }
 0x417   : > { %v1879_v32 = vpop.eup %1878 }
 0x418   : > { %v1881_v33 = vpop.eup %1880  ;;  %v945_v34 = vsel %vm730_vm2, %v1879_v32, 0.0 }
 0x419   : > { %946 = vadd.xlane.f32.xlu0 %v945_v34  ;;  %v942_v35 = vsel %vm730_vm2, %v1881_v33, 0.0 }
 0x41a   : > { %943 = vadd.xlane.f32.xlu1 %v942_v35 }
 0x41f   : > { %v1883_v39 = vpop.eup %1882 }
 0x420   : > { %v948_v40 = vsel %vm730_vm2, %v1883_v39, 0.0 }
 0x42b   : > { %1014 = vrot.lane.b32.xlu1 %v2280_v51, %s2043_s20 }
 0x42f   : > { %1063 = vrot.lane.b32.xlu1 %v2282_v52, %s2043_s20  ;;  %964 = vrot.lane.b32.xlu0 %v2272_v42, %s2043_s20  ;;  %v941_v41 = vpop.xlane.xlu0 %940 }
 0x430   : > { %1884 = vrcp.f32 %v941_v41  ;;  %v1862_v41 = vld [vmem:[#allocation2 + $0x8] sm:$0xff]  }
 0x43d   : > { %v1885_v43 = vpop.eup %1884 }
 0x43e   : > { %v955_v46 = vmul.f32 %v1885_v43, %v1877_v24  ;;  %v1863_v43 = vld [vmem:[#allocation2] sm:$0xff]  }
 0x440   : > { %v959_v50 = vpack.c.bf16 %v955_v46, %v955_v46 }
 0x453   : > { %949 = vadd.xlane.f32.xlu1 %v948_v40 }
 0x464   : > { %1112 = vrot.lane.b32.xlu1 %v2290_v57, %s2043_s20  ;;  %s2406_s20 = scalar_lea.hbm %s2467_s14, %s1629_s25 }
 0x4a2   : > { %v947_v44 = vpop.xlane.xlu0 %946 }
 0x4a3   : > { %1886 = vrcp.f32 %v947_v44  ;;  %v944_v45 = vpop.xlane.xlu1 %943  ;;  %v1865_v44 = vld [vmem:[%s2465_s12 + $0x30] sm:$0xff]  }
 0x4a4   : > { %1888 = vrcp.f32 %v944_v45 }
 0x4a6   : > { %v965_v42 = vpop.permute.xlu0 %964 }
 0x4a7   : > { %v971_v47 = vsel %vm969_vm3, %v965_v42, 0  ;;  %v1015_v48 = vpop.permute.xlu1 %1014 }
 0x4a8   : > { %v1020_v49 = vsel %vm969_vm3, %v1015_v48, 0  ;;  %1710 = vmatpush3.bf16.msra.mxu0 %v971_v47  ;;  %v1613_v48 = vld [vmem:[%s2461_s8] ss:$0 sm:$0xff] }
 0x4a9   : > { %1716 = vmatpush3.bf16.msra.mxu1 %v1020_v49  ;;  %1721 = vmatprep.subr.bf16.mxu0 %v2038_v15 }
 0x4aa   : > { %1727 = vmatprep.subr.bf16.mxu1 %v2038_v15 }
 0x4ab   : > { %v1064_v51 = vpop.permute.xlu1 %1063  ;;  %1712 = vmatmul.mubr.msk.bf16.vlgmr.msra.gmra.mxu0 %vm730_vm2, %v959_v50  ;;  %v1614_v50 = vld [vmem:[%s2462_s9] ss:$0 sm:$0xff] }
 0x4ac   : > { %v1069_v52 = vsel %vm969_vm3, %v1064_v51, 0  ;;  %1723 = vmatprep.mubr.msk.bf16.mxu0 %vm2039_vm1, %v2038_v15 }
 0x4ad   : > { %1722 = vmatpush3.bf16.msra.mxu0 %v1069_v52 }
 0x4ae   : > { %1733 = vmatprep.subr.bf16.mxu0 %v2038_v15 }
 0x4b0   : > { %v1887_v53 = vpop.eup %1886 }
 0x4b1   : > { %v1889_v54 = vpop.eup %1888  ;;  %v957_v55 = vmul.f32 %v1887_v53, %v1879_v32 }
 0x4b2   : > { %v956_v56 = vmul.f32 %v1889_v54, %v1881_v33  ;;  %v1866_v54 = vld [vmem:[%s2465_s12 + $0x28] sm:$0xff]  }
 0x4b3   : > { %v961_v57 = vpack.c.bf16 %v957_v55, %v957_v55  ;;  %v1867_v55 = vld [vmem:[%s2465_s12 + $0x20] sm:$0xff]  }
 0x4b4   : > { %v960_v58 = vpack.c.bf16 %v956_v56, %v956_v56  ;;  %v1868_v56 = vld [vmem:[%s2465_s12 + $0x18] sm:$0xff]  }
 0x4b5   : > { %1724 = vmatmul.mubr.msk.bf16.vlgmr.msra.gmra.mxu0 %vm730_vm2, %v961_v57  ;;  %v1869_v57 = vld [vmem:[%s2465_s12 + $0x10] sm:$0xff]  }
 0x4b6   : > { %1718 = vmatmul.mubr.msk.bf16.vlgmr.msra.gmra.mxu1 %vm730_vm2, %v960_v58  ;;  %1737 = vmatprep.mubr.msk.bf16.mxu0 %vm2039_vm1, %v2038_v15  ;;  %v1870_v58 = vld [vmem:[%s2465_s12 + $0x8] sm:$0xff]  }
 0x4b7   : > { %1729 = vmatprep.mubr.msk.bf16.mxu1 %vm2039_vm1, %v2038_v15  ;;  %1734 = vmatpush3.bf16.msra.mxu0 %v1860_v3 }
 0x4b8   : > { %1735 = vmatprep.subr.bf16.mxu0 %v2038_v15 }
 0x4bb   : > { %1736 = vmatpush3.bf16.msra.mxu0 %v1861_v16 }
 0x4bc   : > { %1749 = vmatprep.subr.bf16.mxu0 %v2038_v15 }
 0x4dc   : > { %v950_v59 = vpop.xlane.xlu1 %949 }
 0x4dd   : > { %1890 = vrcp.f32 %v950_v59  ;;  %v1871_v59 = vld [vmem:[%s2465_s12] sm:$0xff]  }
 0x4e0   : > { %v1113_v60 = vpop.permute.xlu1 %1112 }
 0x4e1   : > { %v1118_v61 = vsel %vm969_vm3, %v1113_v60, 0  ;;  %v1615_v60 = vld [vmem:[#allocation5] ss:$0 sm:$0xff] }
 0x4e2   : > { %1728 = vmatpush3.bf16.msra.mxu1 %v1118_v61 }
 0x4e3   : > { %1741 = vmatprep.subr.bf16.mxu1 %v2038_v15 }
 0x4ea   : > { %v1891_v62 = vpop.eup %1890 }
 0x4eb   : > { %v958_v63 = vmul.f32 %v1891_v62, %v1883_v39 }
 0x4ed   : > { %v962_v1 = vpack.c.bf16 %v958_v63, %v958_v63 }
 0x4ef   : > { %1730 = vmatmul.mubr.msk.bf16.vlgmr.msra.gmra.mxu1 %vm730_vm2, %v962_v1 }
 0x4f0   : > { %1745 = vmatprep.mubr.msk.bf16.mxu1 %vm2039_vm1, %v2038_v15  ;;  %1742 = vmatpush3.bf16.msra.mxu1 %v1862_v41 }
 0x4f1   : > { %1743 = vmatprep.subr.bf16.mxu1 %v2038_v15 }
 0x4f4   : > { %1744 = vmatpush3.bf16.msra.mxu1 %v1863_v43 }
 0x56b   : > { %v1007_v2 = vpop.f32.mrf.mxu0 }
 0x56d   : > { %v1713_v4 = vpop.f32.mrf.mxu0 }
 0x56f   : > { %v1010_v5 = vpop.f32.mrf.mxu0 }
 0x571   : > { %v1714_v6 = vpop.f32.mrf.mxu0 }
 0x575   : > { %v1105_v7 = vpop.f32.mrf.mxu0 }
 0x576   : > { %v1056_v8 = vpop.f32.mrf.mxu1  ;;  %1165 = vrot.lane.b32.xlu1 %v1105_v7, %s2044_s29  ;;  %s1952_s29 = sshll.u32 %s2047_s19, 4  ;;  %s1953_s29 = int_to_ptr.vmem [resolvable:$false] %s1952_s29 }
 0x577   : > { %1161 = vrot.lane.b32.xlu0 %v1056_v8, %s2045_s15  ;;  %v1725_v9 = vpop.f32.mrf.mxu0  ;;  %s519_s15 = sand.u32 1, %s2016_s30   ;;  %v1619_v8 = vld [vmem:[%s2466_s13] ss:$0 sm:$0xff] }
 0x578   : > { %v1719_v10 = vpop.f32.mrf.mxu1  ;;  %s1590_s17 = sshll.u32 %s519_s15, 3  ;;  %s1462_s16 = scalar_lea.sflag [#allocation4], %s519_s15 }
 0x579   : > { %v1108_v11 = vpop.f32.mrf.mxu0  ;;  %s521_s26 = scalar_lea.vmem [#allocation7], %s1590_s17  ;;  %s1954_s17 = scalar_lea.vmem %s1953_s29, 256 }
 0x57a   : > { %v1059_v12 = vpop.f32.mrf.mxu1  ;;  %s1476_s27 = sshll.u32 %s521_s26, 4  ;;  %s2408_s27 = int_to_ptr.vmem [resolvable:$true] %s1476_s27 }
 0x57b   : > { %v1726_v13 = vpop.f32.mrf.mxu0  ;;  %s1948_s22 = scalar_lea.vmem %s2408_s27, 128  ;;  %p1955_p0 = scmp.lt.s32.totalorder %s2408_s27, %s1953_s29 }
 0x57c   : > { %v1720_v14 = vpop.f32.mrf.mxu1  ;;  %p1949_p10 = scmp.ne.s32.totalorder %s2408_s27, %s1948_s22  ;;  %p1956_p7 = scmp.lt.s32.totalorder %s1954_s17, %s1948_s22 }
 0x57e   : > { %p1950_p11 = pnand %p1949_p10, %p2163_p4  ;;  %p1957_p9 = por %p1956_p7, %p1955_p0 }
 0x580   : > { %p1951_p13 = pneg %p1950_p11 }
 0x582   : > { %p1958_p12 = pnand %p1957_p9, %p1951_p13 }
 0x5af   : > { %v1154_v17 = vpop.f32.mrf.mxu1 }
 0x5b0   : > { %1169 = vrot.lane.b32.xlu0 %v1154_v17, %s2046_s21 }
 0x5b1   : > { %v1731_v18 = vpop.f32.mrf.mxu1 }
 0x5b3   : > { %v1157_v19 = vpop.f32.mrf.mxu1 }
 0x5b5   : > { %v1732_v20 = vpop.f32.mrf.mxu1 }
 0x5e8   : > { %v1166_v23 = vpop.permute.xlu1 %1165 }
 0x5e9   : > { %v1162_v21 = vpop.permute.xlu0 %1161 }
 0x5ea   : > { %v1172_v22 = vsel %vm730_vm2, %v1007_v2, %v1162_v21 }
 0x5eb   : > { %v1174_v24 = vsel %vm1173_vm4, %v1172_v22, %v1166_v23 }
 0x622   : > { %v1170_v25 = vpop.permute.xlu0 %1169 }
 0x623   : > { %v1176_v26 = vsel %vm1175_vm5, %v1174_v24, %v1170_v25 }
 0x624   : > { %v1177_v27 = vpack.c.bf16 %v1176_v26, %v1176_v26 }
 0x626   : > { %1738 = vmatmul.mubr.msk.bf16.vlgmr.msra.gmra.mxu0 %vm538_vm0, %v1177_v27 }
 0x627   : > { %1765 = vmatprep.mubr.msk.bf16.mxu0 %vm2039_vm1, %v2038_v15 }
 0x6e6   : > { %v1238_v29 = vpop.f32.mrf.mxu0 }
 0x6e7   : > { %v1239_v30 = vadd.f32 %v1609_v28, %v1238_v29 }
 0x6e8   : > { %v1739_v31 = vpop.f32.mrf.mxu0 }
 0x6e9   : > { %v2352_v32 = vadd.f32 %v1239_v30, %v2230_v0  ;;  %v1864_v0 = vld [vmem:[%s2465_s12 + $0x38] sm:$0xff]  }
 0x6ea   : > { %v1241_v33 = vpop.f32.mrf.mxu0  ;;  %1750 = vmatpush3.bf16.msra.mxu0 %v1864_v0 }
 0x6eb   : > { %v1247_v34 = vsel %vm538_vm0, %v2352_v32, 0.0  ;;  %1751 = vmatprep.subr.bf16.mxu0 %v2038_v15 }
 0x6ec   : > { %1248 = vadd.xlane.f32.xlu1 %v1247_v34  ;;  %v1740_v35 = vpop.f32.mrf.mxu0 }
 0x6ee   : > { %1752 = vmatpush3.bf16.msra.mxu0 %v1865_v44 }
 0x6ef   : > { %1753 = vmatprep.subr.bf16.mxu0 %v2038_v15 }
 0x6f2   : > { %1754 = vmatpush3.bf16.msra.mxu0 %v1866_v54 }
 0x6f3   : > { %1755 = vmatprep.subr.bf16.mxu0 %v2038_v15 }
 0x6f6   : > { %1756 = vmatpush3.bf16.msra.mxu0 %v1867_v55 }
 0x6f7   : > { %1757 = vmatprep.subr.bf16.mxu0 %v2038_v15 }
 0x6fa   : > { %1758 = vmatpush3.bf16.msra.mxu0 %v1868_v56 }
 0x6fb   : > { %1759 = vmatprep.subr.bf16.mxu0 %v2038_v15 }
 0x6fe   : > { %1760 = vmatpush3.bf16.msra.mxu0 %v1869_v57 }
 0x6ff   : > { %1761 = vmatprep.subr.bf16.mxu0 %v2038_v15 }
 0x702   : > { %1762 = vmatpush3.bf16.msra.mxu0 %v1870_v58 }
 0x703   : > { %1763 = vmatprep.subr.bf16.mxu0 %v2038_v15 }
 0x706   : > { %1764 = vmatpush3.bf16.msra.mxu0 %v1871_v59 }
 0x775   : > { %v1249_v36 = vpop.xlane.xlu1 %1248 }
 0x776   : > { %v1250_v37 = vmul.f32 0.03125, %v1249_v36 }
 0x778   : > { %v1251_v38 = vsub.f32 %v2352_v32, %v1250_v37 }
 0x77a   : > { %v1252_v39 = vmul.f32 %v1251_v38, %v1251_v38 }
 0x77c   : > { %v1253_v40 = vsel %vm538_vm0, %v1252_v39, 0.0 }
 0x77d   : > { %1254 = vadd.xlane.f32.xlu0 %v1253_v40 }
 0x806   : > { %v1255_v45 = vpop.xlane.xlu0 %1254 }
 0x807   : > { %v1256_v46 = vmul.f32 0.03125, %v1255_v45 }
 0x809   : > { %v1257_v42 = vadd.f32 1e-05, %v1256_v46 }
 0x80b   : > { %1892 = vrsqrt.f32 %v1257_v42 }
 0x818   : > { %v1893_v47 = vpop.eup %1892 }
 0x819   : > { %v1259_v49 = vmul.f32 %v1893_v47, %v1251_v38 }
 0x81b   : > { %v1266_v51 = vmul.f32 %v1613_v48, %v1259_v49 }
 0x81d   : > { %v1273_v52 = vadd.f32 %v1614_v50, %v1266_v51 }
 0x81f   : > { %v1274_v53 = vpack.c.bf16 %v1273_v52, %v1273_v52 }
 0x821   : > { %1746 = vmatmul.mubr.msk.bf16.vlgmr.msra.gmra.mxu1 %vm538_vm0, %v1274_v53 }
 0x8e1   : > { %v1335_v61 = vpop.f32.mrf.mxu1 }
 0x8e2   : > { %v1336_v62 = vadd.f32 %v1615_v60, %v1335_v61 }
 0x8e3   : > { %v1747_v63 = vpop.f32.mrf.mxu1 }
 0x8e4   : > { %v1343_v1 = vmul.f32 0.70710677, %v1336_v62  ;;  %v1341_v5 = vmul.f32 0.5, %v1336_v62 }
 0x8e5   : > { %v1338_v2 = vpop.f32.mrf.mxu1 }
 0x8e6   : > { %1894 = verf.f32 %v1343_v1 }
 0x8e7   : > { %v1748_v3 = vpop.f32.mrf.mxu1 }
 0x8f3   : > { %v1895_v4 = vpop.eup %1894 }
 0x8f4   : > { %v1345_v6 = vadd.f32 1.0, %v1895_v4 }
 0x8f6   : > { %v1346_v7 = vmul.f32 %v1345_v6, %v1341_v5 }
 0x8f8   : > { %v1347_v15 = vpack.c.bf16 %v1346_v7, %v1346_v7 }
 0x8fa   : > { %1766 = vmatmul.mubr.bf16.vlgmr.msra.gmra.mxu0 %v1347_v15 }
 0x9ba   : > { %v1453_v9 = vpop.f32.mrf.mxu0 }
 0x9bb   : > { %v1454_v10 = vadd.f32 %v1619_v8, %v1453_v9 }
 0x9bc   : > { %v1767_v11 = vpop.f32.mrf.mxu0 }
 0x9bd   : > { %v1459_v12 = vadd.f32 %v1454_v10, %v2352_v32 }
 0x9be   : > { %v1456_v13 = vpop.f32.mrf.mxu0 }
 0x9bf   : > { %1460 = vst.msk [vmem:[%s521_s26] sm:$0xff] %vm538_vm0, %v1459_v12 }
 0x9c0   : > { %v1768_v14 = vpop.f32.mrf.mxu0 }
 0x9c1   : > { %1961 = shalt.err (!%p1958_p12)
}
 0x9c2   : > { %s1962_s18 = scalar_lea.hbm %s2406_s20, 128  ;;  %s1966_s25 = scalar_lea.hbm %s2467_s14, 256 }
 0x9c3   : > { %p1963_p1 = scmp.ne.s32.totalorder %s2406_s20, %s1962_s18  ;;  %p1967_p3 = scmp.lt.s32.totalorder %s2406_s20, %s2467_s14 }
 0x9c4   : > { %p1968_p6 = scmp.lt.s32.totalorder %s1966_s25, %s1962_s18 }
 0x9c5   : > { %p1964_p2 = pnand %p1963_p1, %p2163_p4 }
 0x9c6   : > { %p1969_p8 = por %p1968_p6, %p1967_p3 }
 0x9c7   : > { %p1965_p5 = pneg %p1964_p2 }
 0x9c9   : > { %p1970_p10 = pnand %p1969_p8, %p1965_p5 }
 0x9cb   : > { %1973 = shalt.err (!%p1970_p10)
}
 0x9cc   : > { %1777 = dma.vmem_to_hbm [thread:$0]  (%p2163_p4), %s2408_s27, 128, %s2406_s20, %s1462_s16  }
 0x9cd PF: > { %s2487_s24 = sld [smem:[#allocation14_spill]] }
 0x9ce   : > { %s2488_s22 = sld [smem:[#allocation11_spill]] }
 0x9cf   : > { %s2489_s19 = sld [smem:[#allocation16_spill]] }
 0x9d3   : > { %p1794_p11 = scmp.ge.s32.totalorder %s2487_s24, 2 }
 0x9d4   : > { %s1488_s29 = sand.u32 1, %s2488_s22  }
 0x9d5   : > { %p2490_p13 = scmp.ne.s32.totalorder %s2489_s19, 0  ;;  %s1489_s17 = scalar_lea.sflag [#allocation4], %s1488_s29 }
 0x9d7   : > { %p1787_p0 = pnand %p1794_p11, %p2490_p13 }
 0x9d9   : > { %p1788_p7 = pneg %p1787_p0 }
 0x9db   : > { %2007 = dma.done.wait (%p1788_p7), %s1489_s17, 128  }
 0x9dc   : > { %2009 = vsyncadd (%p1788_p7), %s1489_s17, 4294967168  ;;  %s29_s18 = sadd.s32 1, %s2487_s24   ;;  %s2491_s23 = sld [smem:[#allocation12_spill]] }
 0x9dd   : > { %p26_p9 = scmp.ge.s32.totalorder %s29_s18, 4   ;;  %s2492_s15 = sld [smem:[#allocation17_spill]] }
 0x9de   : > { %s2493_s16 = sld [smem:[#allocation13_spill]]  ;;  %s2495_s29 = smov %s2016_s30 }
 0x9df   : > { %s2494_s17 = sld [smem:[#allocation15_spill]]  ;;  %28 = sbr.rel (!%p26_p9) target bundleno = 6 (0x6), region = 123 }
 0x9e2   : > { %s2496_s30 = smov %s2491_s23 }
 0x9e4   :  { %1494 = vsyncpa [#allocation3], 1 }
 0x9e5   :  { %1496 = vsyncpa [#allocation3 + $0x1], 1 }
 0x9e6   :  { %1497 = vsyncpa [#allocation6], 1 }
 0x9e7   :  { %1498 = vsyncpa [#allocation4], 1 }
 0x9e8   :  { %1500 = vsyncpa [#allocation4 + $0x1], 1 }

</bundles_post_ra>
